<compile_context>
chip_gen: v6e
topology: v6e:2x2x1
jax: 0.10.0
libtpu: 0.0.40
codegen_flags: <defaults>
</compile_context>

<pallas_src>
import jax
import jax.numpy as jnp
from jax.experimental import pallas as pl
from jax.experimental.pallas import tpu as pltpu


def _fm_kernel(x_ref, vmat_ref, rows_ref, bias_ref, out_ref):
    """One grid step: block_b samples in natural (rows, dim) layout.

    x_ref:    (TB, dim)  feature tile (streams, contiguous DMA)
    vmat_ref: (dim, nf)  fm_V               (VMEM-resident constant)
    rows_ref: (2, dim)   [W_fc row; rowsum(fm_V**2) row]  (resident constant)
    bias_ref: (TB, 1)    b_fc + b_users[uid] + b_items[iid]  (streams)
    out_ref:  (TB, 1)
    """
    x = x_ref[...]                                              # (TB, dim) f32

    # Second-order FM term: single MXU matmul at full f32 precision.
    p = jnp.dot(x, vmat_ref[...],
                preferred_element_type=jnp.float32,
                precision=jax.lax.Precision.HIGHEST)            # (TB, nf)
    sum_sq = jnp.sum(p * p, axis=-1, keepdims=True)             # (TB, 1)

    rows = rows_ref[...]                                        # (2, dim)
    w_row = rows[0:1, :]                                        # (1, dim)
    v2s_row = rows[1:2, :]                                      # (1, dim)

    # Linear part and second-order correction on VPU + lane reduce
    # (bias already folded into bias_ref wrapper-side).
    lin = jnp.sum(x * w_row, axis=-1, keepdims=True)            # (TB, 1)
    corr = jnp.sum((x * x) * v2s_row, axis=-1, keepdims=True)   # (TB, 1)

    out = 0.5 * (sum_sq - corr) + lin + bias_ref[...]           # (TB, 1)
    out_ref[...] = out.astype(out_ref.dtype)


def prediction_layer_fm(feature, uids, iids, params, *, block_b=None):
    """PredictionLayer forward with opt.output='fm'.

    feature: (B, dim) float32, uids/iids: (B,) int32.
    params = (W_fc (1,dim), b_fc (1,), fm_V (dim,10), b_users (U,1), b_items (I,1))
    Returns (B, 1) float32.
    """
    W_fc, b_fc, fm_V, b_users, b_items = params
    B, dim = feature.shape
    n_factors = fm_V.shape[1]

    # ---- tile-size selection (trace-time Python) ----
    if block_b is None:
        target = 8192                                   # rows per grid step
        half = -(-B // 2)                               # keep >= 2 steps (v7x megacore)
        block_b = min(target, max(128, half))
    block_b = max(8, -(-block_b // 8) * 8)              # sublane alignment
    # VMEM budget: keep the double-buffered feature tile <= ~8 MiB.
    max_bb = max(8, ((8 * 1024 * 1024) // (2 * dim * 4)) // 8 * 8)
    block_b = min(block_b, max_bb)

    # ---- wrapper-side algebraic folds (exact, trace-time) ----
    # fc bias + user/item bias embeddings folded into one per-sample column.
    bias_col = (b_fc.reshape(1, 1)
                + b_users[uids].reshape(B, 1)
                + b_items[iids].reshape(B, 1)).astype(jnp.float32)   # (B, 1)
    # Merged resident constants: [W_fc row; rowsum(fm_V**2) row].
    rows_const = jnp.concatenate(
        [W_fc.reshape(1, dim),
         jnp.sum(fm_V * fm_V, axis=1).reshape(1, dim)], axis=0)      # (2, dim)

    # ---- pad B up to a multiple of block_b (padded rows produce 0, discarded) ----
    B_pad = pl.cdiv(B, block_b) * block_b
    feat = feature.astype(jnp.float32)
    if B_pad != B:
        feat = jnp.pad(feat, ((0, B_pad - B), (0, 0)))
        bias_col = jnp.pad(bias_col, ((0, B_pad - B), (0, 0)))
    nb = B_pad // block_b

    out = pl.pallas_call(
        _fm_kernel,
        out_shape=jax.ShapeDtypeStruct((B_pad, 1), jnp.float32),
        grid_spec=pltpu.PrefetchScalarGridSpec(
            num_scalar_prefetch=0,
            grid=(nb,),
            in_specs=[
                pl.BlockSpec((block_b, dim), lambda i: (i, 0)),       # feature tile
                pl.BlockSpec((dim, n_factors), lambda i: (0, 0)),     # fm_V (resident)
                pl.BlockSpec((2, dim), lambda i: (0, 0)),             # merged const rows
                pl.BlockSpec((block_b, 1), lambda i: (i, 0)),         # folded bias col
            ],
            out_specs=pl.BlockSpec((block_b, 1), lambda i: (i, 0)),
        ),
        compiler_params=pltpu.CompilerParams(
            dimension_semantics=("parallel",)),
    )(feat, fm_V.astype(jnp.float32), rows_const, bias_col)

    return out[:B]


def prediction_layer_fm_ref(feature, uids, iids, params):
    """Pure-JAX reference (mirrors the PyTorch FM.forward exactly)."""
    W_fc, b_fc, fm_V, b_users, b_items = params
    lin = feature @ W_fc.T + b_fc                              # (B, 1)
    inter1 = (feature @ fm_V) ** 2                             # (B, 10)
    inter2 = (feature ** 2) @ (fm_V ** 2)                      # (B, 10)
    fm_out = 0.5 * jnp.sum(inter1 - inter2, axis=1, keepdims=True) + lin
    return fm_out + b_users[uids] + b_items[iids]


def init_params(key, dim, user_num, item_num, n_factors=10):
    """Deterministic init mirroring FM.init_weight()."""
    k1, k2, k3, k4 = jax.random.split(key, 4)
    W_fc = jax.random.uniform(k1, (1, dim), jnp.float32, -0.05, 0.05)
    b_fc = jnp.zeros((1,), jnp.float32)                        # constant_(bias, 0.0)
    fm_V = jax.random.uniform(k2, (dim, n_factors), jnp.float32, -0.05, 0.05)
    b_users = jax.random.uniform(k3, (user_num, 1), jnp.float32, 0.0, 0.1)
    b_items = jax.random.uniform(k4, (item_num, 1), jnp.float32, 0.0, 0.1)
    return W_fc, b_fc, fm_V, b_users, b_items


if __name__ == "__main__":
    B, dim = 256, 32            # 2 grid steps of 128 rows each (small demo shapes)
    user_num, item_num = 100, 100

    key = jax.random.PRNGKey(0)
    k_f, k_u, k_i, k_p = jax.random.split(key, 4)
    feature = jax.random.normal(k_f, (B, dim), jnp.float32)
    uids = jax.random.randint(k_u, (B,), 0, user_num, dtype=jnp.int32)
    iids = jax.random.randint(k_i, (B,), 0, item_num, dtype=jnp.int32)
    params = init_params(k_p, dim, user_num, item_num)

    out = prediction_layer_fm(feature, uids, iids, params)
    out = jax.block_until_ready(out)

    ref = prediction_layer_fm_ref(feature, uids, iids, params)
    assert out.shape == (B, 1)
    # Full-precision f32 matmul (Precision.HIGHEST) -> only summation-order noise.
    assert jnp.allclose(out, ref, atol=1e-5, rtol=1e-5)

    print("KERNEL_OK")
</pallas_src>

<mosaic_0001>
module attributes {stable_mosaic.version = 11 : i64} {
  func.func @_fm_kernel(%arg0: i32, %arg1: memref<128x32xf32, #tpu.memory_space<vmem>>, %arg2: memref<32x10xf32, #tpu.memory_space<vmem>>, %arg3: memref<2x32xf32, #tpu.memory_space<vmem>>, %arg4: memref<128x1xf32, #tpu.memory_space<vmem>>, %arg5: memref<128x1xf32, #tpu.memory_space<vmem>>) attributes {dimension_semantics = [#tpu.dimension_semantics<parallel>], iteration_bounds = array<i64: 2>, scalar_prefetch = 0 : i64, scratch_operands = 0 : i64, tpu.core_type = #tpu.core_type<tc>, window_params = [{transform_indices = @transform_0, window_bounds = array<i64: 128, 32>}, {pipeline_mode = #tpu.pipeline_mode<synchronous>, transform_indices = @transform_1, window_bounds = array<i64: 32, 10>}, {pipeline_mode = #tpu.pipeline_mode<synchronous>, transform_indices = @transform_2, window_bounds = array<i64: 2, 32>}, {transform_indices = @transform_3, window_bounds = array<i64: 128, 1>}, {transform_indices = @transform_4, window_bounds = array<i64: 128, 1>}]} {
    %c0 = arith.constant 0 : index
    %c0_0 = arith.constant 0 : index
    %0 = vector.load %arg1[%c0, %c0_0] : memref<128x32xf32, #tpu.memory_space<vmem>>, vector<128x32xf32>
    %c0_1 = arith.constant 0 : index
    %c0_2 = arith.constant 0 : index
    %1 = vector.load %arg2[%c0_1, %c0_2] : memref<32x10xf32, #tpu.memory_space<vmem>>, vector<32x10xf32>
    %cst = arith.constant dense<0.000000e+00> : vector<128x10xf32>
    %2 = tpu.matmul %0, %1, %cst {dimension_numbers = #tpu.dot_dimension_numbers<[1], [0], [0], [1], [0, 0, 1, 1], [], []>, precision = #tpu.contract_precision<fp32>} : vector<128x32xf32>, vector<32x10xf32>, vector<128x10xf32> -> vector<128x10xf32>
    %3 = arith.mulf %2, %2 : vector<128x10xf32>
    %cst_3 = arith.constant dense<0.000000e+00> : vector<128xf32>
    %4 = vector.multi_reduction <add>, %3, %cst_3 [1] : vector<128x10xf32> to vector<128xf32>
    %5 = vector.shape_cast %4 : vector<128xf32> to vector<128x1xf32>
    %c0_4 = arith.constant 0 : index
    %c0_5 = arith.constant 0 : index
    %6 = vector.load %arg3[%c0_4, %c0_5] : memref<2x32xf32, #tpu.memory_space<vmem>>, vector<2x32xf32>
    %7 = vector.extract_strided_slice %6 {offsets = [0, 0], sizes = [1, 32], strides = [1, 1]} : vector<2x32xf32> to vector<1x32xf32>
    %8 = vector.extract_strided_slice %6 {offsets = [1, 0], sizes = [1, 32], strides = [1, 1]} : vector<2x32xf32> to vector<1x32xf32>
    %9 = vector.broadcast %7 : vector<1x32xf32> to vector<128x32xf32>
    %10 = arith.mulf %0, %9 : vector<128x32xf32>
    %cst_6 = arith.constant dense<0.000000e+00> : vector<128xf32>
    %11 = vector.multi_reduction <add>, %10, %cst_6 [1] : vector<128x32xf32> to vector<128xf32>
    %12 = vector.shape_cast %11 : vector<128xf32> to vector<128x1xf32>
    %13 = arith.mulf %0, %0 : vector<128x32xf32>
    %14 = vector.broadcast %8 : vector<1x32xf32> to vector<128x32xf32>
    %15 = arith.mulf %13, %14 : vector<128x32xf32>
    %cst_7 = arith.constant dense<0.000000e+00> : vector<128xf32>
    %16 = vector.multi_reduction <add>, %15, %cst_7 [1] : vector<128x32xf32> to vector<128xf32>
    %17 = vector.shape_cast %16 : vector<128xf32> to vector<128x1xf32>
    %18 = arith.subf %5, %17 : vector<128x1xf32>
    %cst_8 = arith.constant 5.000000e-01 : f32
    %19 = vector.broadcast %cst_8 : f32 to vector<128x1xf32>
    %20 = arith.mulf %19, %18 : vector<128x1xf32>
    %21 = arith.addf %20, %12 : vector<128x1xf32>
    %c0_9 = arith.constant 0 : index
    %c0_10 = arith.constant 0 : index
    %22 = vector.load %arg4[%c0_9, %c0_10] : memref<128x1xf32, #tpu.memory_space<vmem>>, vector<128x1xf32>
    %23 = arith.addf %21, %22 : vector<128x1xf32>
    %c0_11 = arith.constant 0 : index
    %c0_12 = arith.constant 0 : index
    %24 = vector.load %arg5[%c0_11, %c0_12] : memref<128x1xf32, #tpu.memory_space<vmem>>, vector<128x1xf32>
    tpu.vector_store %arg5[%c0_11, %c0_12], %23 {strides = array<i32>} : memref<128x1xf32, #tpu.memory_space<vmem>>, vector<128x1xf32>,
    return
  }
  func.func @transform_0(%arg0: i32) -> (i32, i32) {
    %c0_i32 = arith.constant 0 : i32
    %c0_i32_0 = arith.constant 0 : i32
    return %arg0, %c0_i32 : i32, i32
  }
  func.func @transform_1(%arg0: i32) -> (i32, i32) {
    %c0_i32 = arith.constant 0 : i32
    %c0_i32_0 = arith.constant 0 : i32
    %c0_i32_1 = arith.constant 0 : i32
    return %c0_i32, %c0_i32_0 : i32, i32
  }
  func.func @transform_2(%arg0: i32) -> (i32, i32) {
    %c0_i32 = arith.constant 0 : i32
    %c0_i32_0 = arith.constant 0 : i32
    %c0_i32_1 = arith.constant 0 : i32
    return %c0_i32, %c0_i32_0 : i32, i32
  }
  func.func @transform_3(%arg0: i32) -> (i32, i32) {
    %c0_i32 = arith.constant 0 : i32
    %c0_i32_0 = arith.constant 0 : i32
    return %arg0, %c0_i32 : i32, i32
  }
  func.func @transform_4(%arg0: i32) -> (i32, i32) {
    %c0_i32 = arith.constant 0 : i32
    %c0_i32_0 = arith.constant 0 : i32
    return %arg0, %c0_i32 : i32, i32
  }
}

</mosaic_0001>

<bundles_post_ra>
// kernel: tpu_custom_call.1
= control target key start
LH: loop header
LB: loop body
LE: loop exit
PB: predicated region body
PF: predicated region fallthrough
CT: control target
= control target key end

     0   :  { %s2171_s15 = smov 0   ;;  %s2991_s0 = inlined_call_operand.vmem [shape: f32[256,32], index: 0, kind: input, shape index: {}]   ;;  %s2992_s1 = inlined_call_operand.vmem [shape: f32[32,10], index: 1, kind: input, shape index: {}]   ;;  %s2993_s2 = inlined_call_operand.vmem [shape: f32[2,32], index: 2, kind: input, shape index: {}]   ;;  %s2994_s3 = inlined_call_operand.vmem [shape: f32[256,1], index: 3, kind: input, shape index: {}]   ;;  %s2995_s4 = inlined_call_operand.vmem [shape: f32[256,1], index: 4, kind: output, shape index: {}]  }
   0x1 LB: > { %s1805_s16 = sadd.s32 4294967295, %s2144_s15   ;;  %p1809_p0 = scmp.ge.s32.totalorder %s2144_s15, 1  ;;  %s2144_s15 = sphi %s2171_s15, %s14_s15  }
   0x2   : > { %p174_p1 = scmp.lt.s32.totalorder %s2144_s15, 3 }
   0x4   : > { %p175_p2 = pnand %p1809_p0, %p174_p1 }
   0x6   : > { %178 = sbr.rel (%p175_p2) target bundleno = 474 (0x1da), region = 36 }
   0xb   : > { %v242_v0 = vld [vmem:[%s2992_s1 + $0x18] sm:$0xff]  ;;  %v241_v1 = vld [vmem:[%s2992_s1 + $0x10] sm:$0xff]  ;;  %v240_v2 = vld [vmem:[%s2992_s1 + $0x8] sm:$0xff]  ;;  %s1810_s23 = sshll.u32 %s1805_s16, 4  ;;  %vm243_vm0 = vcmask 261120   ;;  %vm1438_vm1 = vcmask 80896  }
   0xc   : > { %v2188_v3 = vand.u32 4294901760, %v242_v0  ;;  %v2190_v4 = vand.u32 4294901760, %v241_v1  ;;  %v2192_v5 = vand.u32 4294901760, %v240_v2  ;;  %v239_v6 = vld [vmem:[%s2992_s1] sm:$0xff]  ;;  %p206_p3 = scmp.lt.s32.totalorder %s1810_s23, 31  ;;  %vm1720_vm2 = vcmask 7168  }
   0xd   : > { %v2197_v7 = vand.u32 4294901760, %v239_v6 }
   0xe   : > { %1938 = vmatprep.subr.mxu0 %v2188_v3  ;;  %v2201_v8 = vsub.f32 %v242_v0, %v2188_v3  ;;  %v2204_v9 = vsub.f32 %v241_v1, %v2190_v4  ;;  %v2207_v10 = vsub.f32 %v240_v2, %v2192_v5  ;;  %s3065_s23 = smov (!%p206_p3, %s1810_s23), 31 }
   0xf   : > { %1939 = vmatpush3.msra.mxu0 %v2188_v3  ;;  %v2211_v11 = vsub.f32 %v239_v6, %v2197_v7  ;;  %s2223_s26 = sshll.u32 %s3065_s23, 3 }
  0x10   : > { %v2214_v12 = vand.u32 4294901760, %v2201_v8  ;;  %1940 = vmatprep.subr.mxu0 %v2190_v4  ;;  %v2218_v13 = vand.u32 4294901760, %v2204_v9  ;;  %v2221_v14 = vand.u32 4294901760, %v2207_v10  ;;  %s2233_s29 = scalar_lea.vmem %s2991_s0, %s2223_s26  ;;  %s2914_s8 = scalar_lea.vmem %s2994_s3, %s2223_s26 }
  0x11   : > { %1941 = vmatpush3.msra.mxu0 %v2190_v4  ;;  %v2227_v15 = vand.u32 4294901760, %v2211_v11  ;;  %v2243_v19 = vld [vmem:[%s2233_s29] sm:$0xff]  ;;  %v2246_v20 = vld [vmem:[%s2233_s29 + $0x8] sm:$0xff]  ;;  %v2249_v21 = vld [vmem:[%s2233_s29 + $0x10] sm:$0xff]  ;;  %s2921_s11 = scalar_lea.vmem %s2995_s4, %s2223_s26 }
  0x12   : > { %v549_v16 = vsub.f32 %v2201_v8, %v2214_v12  ;;  %v556_v17 = vsub.f32 %v2204_v9, %v2218_v13  ;;  %1942 = vmatprep.subr.mxu0 %v2192_v5  ;;  %v563_v18 = vsub.f32 %v2207_v10, %v2221_v14  ;;  %v245_v23 = vsel %vm243_vm0, %v2243_v19, 0  ;;  %v2261_v26 = vld [vmem:[%s2233_s29 + $0x18] sm:$0xff]  ;;  %v2264_v27 = vld [vmem:[%s2233_s29 + $0x20] sm:$0xff]  ;;  %v2267_v28 = vld [vmem:[%s2233_s29 + $0x28] sm:$0xff] }
  0x13   : > { %1943 = vmatpush3.msra.mxu0 %v2192_v5  ;;  %v570_v22 = vsub.f32 %v2211_v11, %v2227_v15  ;;  %v248_v24 = vsel %vm243_vm0, %v2246_v20, 0  ;;  %v251_v25 = vsel %vm243_vm0, %v2249_v21, 0  ;;  %v2270_v32 = vand.u32 4294901760, %v245_v23  ;;  %v2280_v37 = vld [vmem:[%s2233_s29 + $0x30] sm:$0xff]  ;;  %v2283_v38 = vld [vmem:[%s2233_s29 + $0x38] sm:$0xff]  ;;  %v2339_v63 = vld [vmem:[%s2233_s29 + $0x40] sm:$0xff] }
  0x14   : > { %v550_v29 = vand.u32 4294901760, %v549_v16  ;;  %v557_v30 = vand.u32 4294901760, %v556_v17  ;;  %v564_v31 = vand.u32 4294901760, %v563_v18  ;;  %1944 = vmatprep.subr.mxu0 %v2197_v7  ;;  %v2273_v34 = vand.u32 4294901760, %v248_v24  ;;  %v2351_v16 = vld [vmem:[%s2233_s29 + $0x48] sm:$0xff] }
  0x15   : > { %1945 = vmatpush3.msra.mxu0 %v2197_v7  ;;  %v571_v33 = vand.u32 4294901760, %v570_v22  ;;  %v2275_v35 = vand.u32 4294901760, %v251_v25  ;;  %v254_v36 = vsel %vm243_vm0, %v2261_v26, 0  ;;  %v2286_v39 = vsub.f32 %v245_v23, %v2270_v32  ;;  %1978 = vmatprep.mubr.f32.mxu1 %v2270_v32 }
  0x16   : > { %1970 = vmatprep.subr.mxu1 %v550_v29  ;;  %v2289_v40 = vand.u32 4294901760, %v254_v36  ;;  %v257_v41 = vsel %vm243_vm0, %v2264_v27, 0  ;;  %v260_v42 = vsel %vm243_vm0, %v2267_v28, 0  ;;  %2002 = vmatprep.subr.mxu0 %v2201_v8  ;;  %v2297_v43 = vsub.f32 %v248_v24, %v2273_v34  ;;  %v2360_v24 = vld [vmem:[%s2233_s29 + $0x50] sm:$0xff] }
  0x17   : > { %1971 = vmatpush3.msra.mxu1 %v550_v29  ;;  %v2300_v44 = vsub.f32 %v251_v25, %v2275_v35  ;;  %v2302_v45 = vand.u32 4294901760, %v257_v41  ;;  %v2304_v46 = vand.u32 4294901760, %v260_v42  ;;  %v3003_v47 = vand.u32 4294901760, %v2286_v39 }
  0x18   : > { %1972 = vmatprep.subr.mxu1 %v557_v30  ;;  %v2308_v48 = vsub.f32 %v254_v36, %v2289_v40  ;;  %v263_v49 = vsel %vm243_vm0, %v2280_v37, 0  ;;  %v266_v50 = vsel %vm243_vm0, %v2283_v38, 0  ;;  %v3001_v51 = vand.u32 4294901760, %v2297_v43 }
  0x19   : > { %1973 = vmatpush3.msra.mxu1 %v557_v30  ;;  %v3000_v52 = vand.u32 4294901760, %v2300_v44  ;;  %v2317_v53 = vsub.f32 %v257_v41, %v2302_v45  ;;  %v2320_v54 = vsub.f32 %v260_v42, %v2304_v46  ;;  %v364_v55 = vsub.f32 %v2286_v39, %v3003_v47 }
  0x1a   : > { %1974 = vmatprep.subr.mxu1 %v564_v31  ;;  %v2999_v56 = vand.u32 4294901760, %v2308_v48  ;;  %v2326_v57 = vand.u32 4294901760, %v263_v49  ;;  %v2328_v58 = vand.u32 4294901760, %v266_v50  ;;  %v374_v59 = vsub.f32 %v2297_v43, %v3001_v51  ;;  %v2423_v51 = vld [vmem:[%s2233_s29 + $0x78] sm:$0xff] }
  0x1b   : > { %1975 = vmatpush3.msra.mxu1 %v564_v31  ;;  %v384_v60 = vsub.f32 %v2300_v44, %v3000_v52  ;;  %v2998_v61 = vand.u32 4294901760, %v2317_v53  ;;  %v2997_v62 = vand.u32 4294901760, %v2320_v54  ;;  %v365_v0 = vand.u32 4294901760, %v364_v55  ;;  %v2368_v31 = vld [vmem:[%s2233_s29 + $0x58] sm:$0xff]  ;;  %3019 = vst [vmem:[#allocation5_spill] sm:$0xff] %v2423_v51 }
  0x1c   : > { %1976 = vmatprep.subr.mxu1 %v571_v33  ;;  %v394_v1 = vsub.f32 %v2308_v48, %v2999_v56  ;;  %v2345_v2 = vsub.f32 %v263_v49, %v2326_v57  ;;  %v2348_v6 = vsub.f32 %v266_v50, %v2328_v58  ;;  %v375_v17 = vand.u32 4294901760, %v374_v59 }
  0x1d   : > { %1977 = vmatpush3.msra.mxu1 %v571_v33  ;;  %v385_v18 = vand.u32 4294901760, %v384_v60  ;;  %v404_v22 = vsub.f32 %v2317_v53, %v2998_v61  ;;  %v414_v23 = vsub.f32 %v2320_v54, %v2997_v62  ;;  %1946 = vmatprep.mubr.f32.mxu0 %v365_v0  ;;  %v269_v30 = vsel %vm243_vm0, %v2339_v63, 0  ;;  %v2371_v33 = vld [vmem:[%s2233_s29 + $0x60] sm:$0xff]  ;;  %v2388_v0 = vld [vmem:[%s2233_s29 + $0x68] sm:$0xff] }
  0x1e   : > { %1979 = vmatmul.mubr.f32.vlgmr.msra.gmra.mxu1 %v2273_v34  ;;  %v2996_v25 = vand.u32 4294901760, %v2345_v2  ;;  %v3002_v29 = vand.u32 4294901760, %v2348_v6  ;;  %3016 = vst [vmem:[#allocation2_spill] sm:$0xff] %v2371_v33  ;;  %1947 = vmatmul.mubr.f32.vlgmr.msra.gmra.mxu0 %v375_v17  ;;  %v395_v36 = vand.u32 4294901760, %v394_v1  ;;  %v2374_v42 = vand.u32 4294901760, %v269_v30  ;;  %3017 = vst [vmem:[#allocation3_spill] sm:$0xff] %v2388_v0 }
  0x1f   : > { %2034 = vmatprep.subr.mxu1 %v2188_v3  ;;  %v405_v41 = vand.u32 4294901760, %v404_v22  ;;  %v272_v49 = vsel %vm243_vm0, %v2351_v16, 0  ;;  %2003 = vmatpush3.msra.mxu0 %v2201_v8  ;;  %v415_v50 = vand.u32 4294901760, %v414_v23  ;;  %v275_v60 = vsel %vm243_vm0, %v2360_v24, 0  ;;  %v2401_v23 = vld [vmem:[%s2233_s29 + $0x70] sm:$0xff] }
  0x20   : > { %2035 = vmatpush3.msra.mxu1 %v2188_v3  ;;  %v424_v55 = vsub.f32 %v2345_v2, %v2996_v25  ;;  %v2383_v59 = vand.u32 4294901760, %v272_v49  ;;  %1949 = vmatprep.mubr.f32.mxu0 %v385_v18  ;;  %v2392_v1 = vsub.f32 %v269_v30, %v2374_v42  ;;  %v2394_v8 = vand.u32 4294901760, %v275_v60  ;;  %3018 = vst [vmem:[#allocation4_spill] sm:$0xff] %v2401_v23 }
  0x21   : > { %1981 = vmatprep.mubr.f32.mxu1 %v2275_v35  ;;  %v278_v17 = vsel %vm243_vm0, %v2368_v31, 0  ;;  %v281_v22 = vsel %vm243_vm0, %v2371_v33, 0  ;;  %2004 = vmatprep.subr.mxu0 %v2204_v9  ;;  %v434_v30 = vsub.f32 %v2348_v6, %v3002_v29 }
  0x22   : > { %1982 = vmatmul.mubr.f32.gmra.mxu1 %v2289_v40  ;;  %v425_v18 = vand.u32 4294901760, %v424_v55  ;;  %v2409_v25 = vsub.f32 %v272_v49, %v2383_v59  ;;  %v2411_v62 = vand.u32 4294901760, %v278_v17  ;;  %1950 = vmatmul.mubr.f32.gmra.mxu0 %v395_v36  ;;  %v3006_v61 = vand.u32 4294901760, %v2392_v1 }
  0x23   : > { %1984 = vmatprep.mubr.f32.mxu1 %v2302_v45  ;;  %v2416_v56 = vsub.f32 %v275_v60, %v2394_v8  ;;  %v2418_v52 = vand.u32 4294901760, %v281_v22  ;;  %v284_v55 = vsel %vm243_vm0, %v2388_v0, 0  ;;  %1952 = vmatprep.mubr.f32.mxu0 %v405_v41  ;;  %v287_v60 = vsel %vm243_vm0, %v2401_v23, 0 }
  0x24   : > { %2005 = vmatpush3.msra.mxu0 %v2204_v9  ;;  %v2428_v36 = vsub.f32 %v278_v17, %v2411_v62  ;;  %v2430_v29 = vand.u32 4294901760, %v284_v55  ;;  %2036 = vmatprep.subr.mxu1 %v2190_v4  ;;  %v444_v47 = vsub.f32 %v2392_v1, %v3006_v61  ;;  %v2443_v17 = vand.u32 4294901760, %v287_v60 }
  0x25   : > { %2006 = vmatprep.subr.mxu0 %v2207_v10  ;;  %v2441_v41 = vsub.f32 %v281_v22, %v2418_v52  ;;  %v435_v49 = vand.u32 4294901760, %v434_v30  ;;  %v290_v23 = vsel %vm243_vm0, %v2423_v51, 0  ;;  %2037 = vmatpush3.msra.mxu1 %v2190_v4  ;;  %v3020_v0 = vand.u32 4294901760, %v2409_v25 }
  0x26   : > { %1985 = vmatmul.mubr.f32.gmra.mxu1 %v2304_v46  ;;  %2007 = vmatpush3.msra.mxu0 %v2207_v10  ;;  %v445_v61 = vand.u32 4294901760, %v444_v47  ;;  %v473_v22 = vand.u32 4294901760, %v2428_v36  ;;  %v2455_v33 = vsub.f32 %v284_v55, %v2430_v29  ;;  %v3021_v10 = vand.u32 4294901760, %v2416_v56 }
  0x27   : > { %1953 = vmatmul.mubr.f32.gmra.mxu0 %v415_v50  ;;  %v454_v9 = vsub.f32 %v2409_v25, %v3020_v0  ;;  %1987 = vmatprep.mubr.f32.mxu1 %v2326_v57  ;;  %v3013_v50 = vand.u32 4294901760, %v2441_v41  ;;  %v2463_v47 = vsub.f32 %v287_v60, %v2443_v17  ;;  %v2465_v51 = vand.u32 4294901760, %v290_v23 }
  0x28   : > { %1955 = vmatprep.mubr.f32.mxu0 %v425_v18  ;;  %v464_v30 = vsub.f32 %v2416_v56, %v3021_v10  ;;  %2038 = vmatprep.subr.mxu1 %v2192_v5  ;;  %v474_v18 = vsub.f32 %v2428_v36, %v473_v22  ;;  %v493_v55 = vand.u32 4294901760, %v2455_v33 }
  0x29   : > { %2008 = vmatprep.subr.mxu0 %v2211_v11  ;;  %v455_v0 = vand.u32 4294901760, %v454_v9  ;;  %v2477_v60 = vsub.f32 %v290_v23, %v2465_v51  ;;  %2039 = vmatpush3.msra.mxu1 %v2192_v5 }
  0x2a   : > { %1988 = vmatmul.mubr.f32.gmra.mxu1 %v2328_v58  ;;  %2009 = vmatpush3.msra.mxu0 %v2211_v11  ;;  %v465_v10 = vand.u32 4294901760, %v464_v30  ;;  %v484_v11 = vsub.f32 %v2441_v41, %v3013_v50  ;;  %v475_v23 = vand.u32 4294901760, %v474_v18 }
  0x2b   : > { %1956 = vmatmul.mubr.f32.gmra.mxu0 %v435_v49  ;;  %1990 = vmatprep.mubr.f32.mxu1 %v2374_v42  ;;  %v503_v49 = vand.u32 4294901760, %v2463_v47  ;;  %v513_v9 = vand.u32 4294901760, %v2477_v60 }
  0x2c   : > { %1958 = vmatprep.mubr.f32.mxu0 %v445_v61  ;;  %2040 = vmatprep.subr.mxu1 %v2197_v7  ;;  %v494_v61 = vsub.f32 %v2455_v33, %v493_v55  ;;  %v485_v30 = vand.u32 4294901760, %v484_v11 }
  0x2d   : > { %2066 = vmatprep.subr.mxu0 %v2214_v12  ;;  %2041 = vmatpush3.msra.mxu1 %v2197_v7  ;;  %v504_v50 = vsub.f32 %v2463_v47, %v503_v49  ;;  %v514_v18 = vsub.f32 %v2477_v60, %v513_v9 }
  0x2e   : > { %1991 = vmatmul.mubr.f32.gmra.mxu1 %v2383_v59  ;;  %2098 = vmatprep.subr.mxu1 %v2188_v3 }
  0x2f   : > { %1959 = vmatmul.mubr.f32.gmra.mxu0 %v455_v0  ;;  %1993 = vmatprep.mubr.f32.mxu1 %v2394_v8  ;;  %v495_v0 = vand.u32 4294901760, %v494_v61  ;;  %v515_v11 = vand.u32 4294901760, %v514_v18  ;;  %v3023_v61 = vand.u32 4294901760, %v2297_v43 }
  0x30   : > { %1961 = vmatprep.mubr.f32.mxu0 %v465_v10  ;;  %v505_v10 = vand.u32 4294901760, %v504_v50  ;;  %v3024_v50 = vand.u32 4294901760, %v2300_v44 }
  0x32   : > { %1994 = vmatmul.mubr.f32.gmra.mxu1 %v2411_v62 }
  0x33   : > { %1962 = vmatmul.mubr.f32.gmra.mxu0 %v475_v23  ;;  %1996 = vmatprep.mubr.f32.mxu1 %v2418_v52  ;;  %v3022_v23 = vand.u32 4294901760, %v2286_v39 }
  0x34   : > { %1964 = vmatprep.mubr.f32.mxu0 %v485_v30  ;;  %v3025_v30 = vand.u32 4294901760, %v2308_v48 }
  0x36   : > { %1997 = vmatmul.mubr.f32.gmra.mxu1 %v2430_v29 }
  0x37   : > { %1965 = vmatmul.mubr.f32.gmra.mxu0 %v495_v0  ;;  %1999 = vmatprep.mubr.f32.mxu1 %v2443_v17 }
  0x38   : > { %1967 = vmatprep.mubr.f32.mxu0 %v505_v10 }
  0x3a   : > { %2000 = vmatmul.mubr.f32.gmra.mxu1 %v2465_v51 }
  0x3b   : > { %1968 = vmatmul.mubr.f32.gmra.mxu0 %v515_v11  ;;  %2042 = vmatprep.mubr.f32.mxu1 %v3022_v23  ;;  %v1567_v11 = vmul.f32 %v2368_v31, %v2368_v31  ;;  %v3034_v23 = vld [vmem:[#allocation2_spill] sm:$0xff] }
  0x3c   : > { %2010 = vmatprep.mubr.f32.mxu0 %v2286_v39  ;;  %v3026_v39 = vand.u32 4294901760, %v2317_v53 }
  0x3e   : > { %2043 = vmatmul.mubr.f32.vlgmr.msra.gmra.mxu1 %v3023_v61  ;;  %v1568_v61 = vmul.f32 %v3034_v23, %v3034_v23 }
  0x3f   : > { %2011 = vmatmul.mubr.f32.vlgmr.msra.gmra.mxu0 %v2297_v43  ;;  %2099 = vmatpush3.msra.mxu1 %v2188_v3  ;;  %v3027_v3 = vand.u32 4294901760, %v2320_v54 }
  0x40   : > { %2067 = vmatpush3.msra.mxu0 %v2214_v12  ;;  %2013 = vmatprep.mubr.f32.mxu0 %v2300_v44  ;;  %v3028_v12 = vand.u32 4294901760, %v2345_v2 }
  0x41   : > { %2045 = vmatprep.mubr.f32.mxu1 %v3024_v50  ;;  %2068 = vmatprep.subr.mxu0 %v2218_v13 }
  0x42   : > { %2046 = vmatmul.mubr.f32.gmra.mxu1 %v3025_v30  ;;  %2069 = vmatpush3.msra.mxu0 %v2218_v13  ;;  %v3030_v13 = vand.u32 4294901760, %v2392_v1 }
  0x43   : > { %2014 = vmatmul.mubr.f32.gmra.mxu0 %v2308_v48  ;;  %2048 = vmatprep.mubr.f32.mxu1 %v3026_v39  ;;  %v1557_v48 = vmul.f32 %v2246_v20, %v2246_v20 }
  0x44   : > { %2016 = vmatprep.mubr.f32.mxu0 %v2317_v53  ;;  %2100 = vmatprep.subr.mxu1 %v2190_v4  ;;  %v1558_v53 = vmul.f32 %v2249_v21, %v2249_v21 }
  0x45   : > { %2101 = vmatpush3.msra.mxu1 %v2190_v4  ;;  %2070 = vmatprep.subr.mxu0 %v2221_v14  ;;  %v3029_v4 = vand.u32 4294901760, %v2348_v6 }
  0x46   : > { %2049 = vmatmul.mubr.f32.gmra.mxu1 %v3027_v3  ;;  %2071 = vmatpush3.msra.mxu0 %v2221_v14  ;;  %v3032_v14 = vand.u32 4294901760, %v2416_v56  ;;  %v3035_v3 = vld [vmem:[#allocation3_spill] sm:$0xff] }
  0x47   : > { %2017 = vmatmul.mubr.f32.gmra.mxu0 %v2320_v54  ;;  %2051 = vmatprep.mubr.f32.mxu1 %v3028_v12  ;;  %v1569_v12 = vmul.f32 %v3035_v3, %v3035_v3 }
  0x48   : > { %2019 = vmatprep.mubr.f32.mxu0 %v2345_v2  ;;  %2102 = vmatprep.subr.mxu1 %v2192_v5  ;;  %v1559_v2 = vmul.f32 %v2261_v26, %v2261_v26 }
  0x49   : > { %2103 = vmatpush3.msra.mxu1 %v2192_v5  ;;  %2072 = vmatprep.subr.mxu0 %v2227_v15  ;;  %v3031_v5 = vand.u32 4294901760, %v2409_v25 }
  0x4a   : > { %2052 = vmatmul.mubr.f32.gmra.mxu1 %v3029_v4  ;;  %2073 = vmatpush3.msra.mxu0 %v2227_v15  ;;  %v3033_v15 = vand.u32 4294901760, %v2441_v41  ;;  %v3036_v4 = vld [vmem:[#allocation4_spill] sm:$0xff] }
  0x4b   : > { %2020 = vmatmul.mubr.f32.gmra.mxu0 %v2348_v6  ;;  %2054 = vmatprep.mubr.f32.mxu1 %v3030_v13  ;;  %v1570_v13 = vmul.f32 %v3036_v4, %v3036_v4 }
  0x4c   : > { %2022 = vmatprep.mubr.f32.mxu0 %v2392_v1  ;;  %2104 = vmatprep.subr.mxu1 %v2197_v7  ;;  %v1561_v1 = vmul.f32 %v2267_v28, %v2267_v28 }
  0x4d   : > { %2105 = vmatpush3.msra.mxu1 %v2197_v7  ;;  %v1488_v7 = vlaneseq }
  0x4e   : > { %2055 = vmatmul.mubr.f32.gmra.mxu1 %v3031_v5 }
  0x4f   : > { %2023 = vmatmul.mubr.f32.gmra.mxu0 %v2409_v25  ;;  %2057 = vmatprep.mubr.f32.mxu1 %v3032_v14  ;;  %v2574_v43 = vshrl.u32 %v1488_v7, 7 }
  0x50   : > { %2025 = vmatprep.mubr.f32.mxu0 %v2416_v56 }
  0x52   : > { %2058 = vmatmul.mubr.f32.gmra.mxu1 %v473_v22 }
  0x53   : > { %2026 = vmatmul.mubr.f32.gmra.mxu0 %v2428_v36  ;;  %2060 = vmatprep.mubr.f32.mxu1 %v3033_v15  ;;  %v1490_v15 = vsub.s32 0, %v2574_v43 }
  0x54   : > { %2028 = vmatprep.mubr.f32.mxu0 %v2441_v41 }
  0x56   : > { %2061 = vmatmul.mubr.f32.gmra.mxu1 %v493_v55 }
  0x57   : > { %2029 = vmatmul.mubr.f32.gmra.mxu0 %v2455_v33  ;;  %2063 = vmatprep.mubr.f32.mxu1 %v503_v49 }
  0x58   : > { %2031 = vmatprep.mubr.f32.mxu0 %v2463_v47  ;;  %v1563_v47 = vmul.f32 %v2283_v38, %v2283_v38 }
  0x5a   : > { %2064 = vmatmul.mubr.f32.gmra.mxu1 %v513_v9  ;;  %v1565_v9 = vmul.f32 %v2351_v16, %v2351_v16 }
  0x5b   : > { %2032 = vmatmul.mubr.f32.gmra.mxu0 %v2477_v60  ;;  %2106 = vmatprep.mubr.f32.mxu1 %v2270_v32 }
  0x5c   : > { %2074 = vmatprep.mubr.f32.mxu0 %v2270_v32  ;;  %v1574_v32 = vsub.s32 1, %v2574_v43 }
  0x5e   : > { %2107 = vmatmul.mubr.f32.vlgmr.msra.gmra.mxu1 %v2273_v34 }
  0x5f   : > { %2075 = vmatmul.mubr.f32.vlgmr.msra.gmra.mxu0 %v2273_v34  ;;  %2109 = vmatprep.mubr.f32.mxu1 %v2275_v35  ;;  %v2583_v34 = vld [vmem:[%s2993_s2] sm:$0x3] }
  0x60   : > { %2077 = vmatprep.mubr.f32.mxu0 %v2275_v35  ;;  %v1556_v35 = vmul.f32 %v2243_v19, %v2243_v19  ;;  %v2589_v44 = vrot.slane %v2583_v34, %v1574_v32 }
  0x62   : > { %2110 = vmatmul.mubr.f32.gmra.mxu1 %v2289_v40  ;;  %v1578_v54 = vmul.f32 %v2589_v44, %v1558_v53  ;;  %v1579_v6 = vmul.f32 %v2589_v44, %v1559_v2  ;;  %v1587_v50 = vmul.f32 %v2589_v44, %v1567_v11  ;;  %v1589_v5 = vmul.f32 %v2589_v44, %v1569_v12 }
  0x63   : > { %2078 = vmatmul.mubr.f32.gmra.mxu0 %v2289_v40  ;;  %2112 = vmatprep.mubr.f32.mxu1 %v2302_v45  ;;  %v1576_v40 = vmul.f32 %v2589_v44, %v1556_v35  ;;  %v1590_v14 = vmul.f32 %v2589_v44, %v1570_v13  ;;  %v3037_v35 = vld [vmem:[#allocation5_spill] sm:$0xff] }
  0x64   : > { %2080 = vmatprep.mubr.f32.mxu0 %v2302_v45  ;;  %v1601_v33 = vsel %vm243_vm0, %v1579_v6, 0.0  ;;  %v1625_v30 = vsel %vm243_vm0, %v1587_v50, 0.0  ;;  %v1631_v7 = vsel %vm243_vm0, %v1589_v5, 0.0 }
  0x65   : > { %v1592_v45 = vsel %vm243_vm0, %v1576_v40, 0.0  ;;  %v1634_v32 = vsel %vm243_vm0, %v1590_v14, 0.0  ;;  %v1571_v40 = vmul.f32 %v3037_v35, %v3037_v35 }
  0x66   : > { %2113 = vmatmul.mubr.f32.gmra.mxu1 %v2304_v46  ;;  %1593 = vadd.xlane.f32.xlu0 %v1592_v45  ;;  %v2674_v45 = vrot.slane %v2583_v34, %v1490_v15 }
  0x67   : > { %2081 = vmatmul.mubr.f32.gmra.mxu0 %v2304_v46  ;;  %2115 = vmatprep.mubr.f32.mxu1 %v2326_v57  ;;  %v1577_v46 = vmul.f32 %v2589_v44, %v1557_v48  ;;  %v1591_v48 = vmul.f32 %v2589_v44, %v1571_v40 }
  0x68   : > { %2083 = vmatprep.mubr.f32.mxu0 %v2326_v57  ;;  %v1598_v57 = vsel %vm243_vm0, %v1578_v54, 0.0  ;;  %3038 = vst [vmem:[#allocation2_spill] sm:$0xff] %v2674_v45  ;;  %v1492_v53 = vmul.f32 %v2674_v45, %v2243_v19  ;;  %v1493_v54 = vmul.f32 %v2674_v45, %v2246_v20  ;;  %v1495_v19 = vmul.f32 %v2674_v45, %v2261_v26 }
  0x69   : > { %v1595_v56 = vsel %vm243_vm0, %v1577_v46, 0.0  ;;  %v1637_v43 = vsel %vm243_vm0, %v1591_v48, 0.0 }
  0x6a   : > { %2116 = vmatmul.mubr.f32.gmra.mxu1 %v2328_v58  ;;  %1596 = vadd.xlane.f32.xlu1 %v1595_v56  ;;  %v1508_v46 = vsel %vm243_vm0, %v1492_v53, 0.0  ;;  %v1494_v56 = vmul.f32 %v2674_v45, %v2249_v21  ;;  %v1511_v34 = vsel %vm243_vm0, %v1493_v54, 0.0  ;;  %v1517_v2 = vsel %vm243_vm0, %v1495_v19, 0.0 }
  0x6b   : > { %2084 = vmatmul.mubr.f32.gmra.mxu0 %v2328_v58  ;;  %2118 = vmatprep.mubr.f32.mxu1 %v2374_v42  ;;  %v1560_v58 = vmul.f32 %v2264_v27, %v2264_v27  ;;  %v1497_v21 = vmul.f32 %v2674_v45, %v2267_v28 }
  0x6c   : > { %2086 = vmatprep.mubr.f32.mxu0 %v2374_v42  ;;  %1599 = vadd.xlane.f32.xlu0 %v1598_v57  ;;  %v1496_v57 = vmul.f32 %v2674_v45, %v2264_v27  ;;  %v1499_v27 = vmul.f32 %v2674_v45, %v2283_v38 }
  0x6d   : > { %v1580_v25 = vmul.f32 %v2589_v44, %v1560_v58  ;;  %v1498_v58 = vmul.f32 %v2674_v45, %v2280_v37  ;;  %v1523_v6 = vsel %vm243_vm0, %v1497_v21, 0.0 }
  0x6e   : > { %2119 = vmatmul.mubr.f32.gmra.mxu1 %v2383_v59  ;;  %1602 = vadd.xlane.f32.xlu1 %v1601_v33  ;;  %v1520_v20 = vsel %vm243_vm0, %v1496_v57, 0.0  ;;  %v1529_v33 = vsel %vm243_vm0, %v1499_v27, 0.0 }
  0x6f   : > { %2087 = vmatmul.mubr.f32.gmra.mxu0 %v2383_v59  ;;  %2121 = vmatprep.mubr.f32.mxu1 %v2394_v8  ;;  %v1604_v42 = vsel %vm243_vm0, %v1580_v25, 0.0  ;;  %v1562_v59 = vmul.f32 %v2280_v37, %v2280_v37  ;;  %v1526_v26 = vsel %vm243_vm0, %v1498_v58, 0.0  ;;  %v1500_v25 = vmul.f32 %v2674_v45, %v2339_v63 }
  0x70   : > { %2089 = vmatprep.mubr.f32.mxu0 %v2394_v8  ;;  %v1581_v8 = vmul.f32 %v2589_v44, %v1561_v1  ;;  %1605 = vadd.xlane.f32.xlu0 %v1604_v42  ;;  %v1501_v37 = vmul.f32 %v2674_v45, %v2351_v16  ;;  %v1502_v42 = vmul.f32 %v2674_v45, %v2360_v24 }
  0x71   : > { %v1582_v36 = vmul.f32 %v2589_v44, %v1562_v59  ;;  %v1532_v28 = vsel %vm243_vm0, %v1500_v25, 0.0  ;;  %v1504_v59 = vmul.f32 %v2674_v45, %v3034_v23 }
  0x72   : > { %2122 = vmatmul.mubr.f32.gmra.mxu1 %v2411_v62  ;;  %v1607_v41 = vsel %vm243_vm0, %v1581_v8, 0.0  ;;  %v1535_v1 = vsel %vm243_vm0, %v1501_v37, 0.0  ;;  %v1538_v38 = vsel %vm243_vm0, %v1502_v42, 0.0 }
  0x73   : > { %2090 = vmatmul.mubr.f32.gmra.mxu0 %v2411_v62  ;;  %2124 = vmatprep.mubr.f32.mxu1 %v2418_v52  ;;  %v1610_v22 = vsel %vm243_vm0, %v1582_v36, 0.0  ;;  %v1564_v62 = vmul.f32 %v2339_v63, %v2339_v63  ;;  %v1503_v63 = vmul.f32 %v2674_v45, %v2368_v31  ;;  %v1544_v16 = vsel %vm243_vm0, %v1504_v59, 0.0 }
  0x74   : > { %2092 = vmatprep.mubr.f32.mxu0 %v2418_v52  ;;  %1608 = vadd.xlane.f32.xlu1 %v1607_v41  ;;  %v1583_v52 = vmul.f32 %v2589_v44, %v1563_v47 }
  0x75   : > { %v1584_v55 = vmul.f32 %v2589_v44, %v1564_v62  ;;  %1611 = vadd.xlane.f32.xlu0 %v1610_v22  ;;  %v1541_v8 = vsel %vm243_vm0, %v1503_v63, 0.0 }
  0x76   : > { %2125 = vmatmul.mubr.f32.gmra.mxu1 %v2430_v29  ;;  %v1613_v60 = vsel %vm243_vm0, %v1583_v52, 0.0 }
  0x77   : > { %2093 = vmatmul.mubr.f32.gmra.mxu0 %v2430_v29  ;;  %2127 = vmatprep.mubr.f32.mxu1 %v2443_v17  ;;  %v1616_v49 = vsel %vm243_vm0, %v1584_v55, 0.0  ;;  %v1566_v29 = vmul.f32 %v2360_v24, %v2360_v24  ;;  %v1505_v24 = vmul.f32 %v2674_v45, %v3035_v3 }
  0x78   : > { %2095 = vmatprep.mubr.f32.mxu0 %v2443_v17  ;;  %1614 = vadd.xlane.f32.xlu1 %v1613_v60  ;;  %v1585_v17 = vmul.f32 %v2589_v44, %v1565_v9 }
  0x79   : > { %v1586_v0 = vmul.f32 %v2589_v44, %v1566_v29  ;;  %1617 = vadd.xlane.f32.xlu0 %v1616_v49  ;;  %v1547_v36 = vsel %vm243_vm0, %v1505_v24, 0.0 }
  0x7a   : > { %2128 = vmatmul.mubr.f32.gmra.mxu1 %v2465_v51  ;;  %v1619_v18 = vsel %vm243_vm0, %v1585_v17, 0.0 }
  0x7b   : > { %2096 = vmatmul.mubr.f32.gmra.mxu0 %v2465_v51  ;;  %v1622_v10 = vsel %vm243_vm0, %v1586_v0, 0.0  ;;  %v1588_v51 = vmul.f32 %v2589_v44, %v1568_v61  ;;  %v1514_v44 = vsel %vm243_vm0, %v1494_v56, 0.0 }
  0x7c   : > { %1620 = vadd.xlane.f32.xlu1 %v1619_v18 }
  0x7d   : > { %1623 = vadd.xlane.f32.xlu0 %v1622_v10  ;;  %v1628_v39 = vsel %vm243_vm0, %v1588_v51, 0.0 }
  0x80   : > { %1626 = vadd.xlane.f32.xlu1 %v1625_v30 }
  0x81   : > { %1629 = vadd.xlane.f32.xlu0 %v1628_v39 }
  0x84   : > { %1632 = vadd.xlane.f32.xlu1 %v1631_v7 }
  0x85   : > { %1635 = vadd.xlane.f32.xlu0 %v1634_v32 }
  0x88   : > { %1638 = vadd.xlane.f32.xlu1 %v1637_v43 }
  0x89   : > { %1509 = vadd.xlane.f32.xlu0 %v1508_v46 }
  0x8c   : > { %1512 = vadd.xlane.f32.xlu1 %v1511_v34 }
  0x8d   : > { %1515 = vadd.xlane.f32.xlu0 %v1514_v44 }
  0x90   : > { %1518 = vadd.xlane.f32.xlu1 %v1517_v2 }
  0x91   : > { %1521 = vadd.xlane.f32.xlu0 %v1520_v20 }
  0x94   : > { %1524 = vadd.xlane.f32.xlu1 %v1523_v6 }
  0x95   : > { %1527 = vadd.xlane.f32.xlu0 %v1526_v26 }
  0x98   : > { %1530 = vadd.xlane.f32.xlu1 %v1529_v33 }
  0x99   : > { %1533 = vadd.xlane.f32.xlu0 %v1532_v28 }
  0x9c   : > { %1536 = vadd.xlane.f32.xlu1 %v1535_v1 }
  0x9d   : > { %1539 = vadd.xlane.f32.xlu0 %v1538_v38 }
  0xa0   : > { %1542 = vadd.xlane.f32.xlu1 %v1541_v8 }
  0xa1   : > { %1545 = vadd.xlane.f32.xlu0 %v1544_v16 }
  0xa4   : > { %1548 = vadd.xlane.f32.xlu1 %v1547_v36 }
  0xde   : > { %v1980_v41 = vpop.f32.mrf.mxu1  ;;  %v1948_v22 = vpop.f32.mrf.mxu0 }
  0xdf   : > { %v615_v16 = vadd.f32 %v1980_v41, %v1948_v22 }
  0xe0   : > { %v608_v47 = vpop.f32.mrf.mxu1  ;;  %v367_v31 = vpop.f32.mrf.mxu0 }
  0xe1   : > { %v609_v35 = vadd.f32 %v608_v47, %v367_v31 }
  0xe2   : > { %v1983_v62 = vpop.f32.mrf.mxu1  ;;  %v1951_v52 = vpop.f32.mrf.mxu0 }
  0xe4   : > { %v2720_v55 = vpop.f32.mrf.mxu1  ;;  %v387_v60 = vpop.f32.mrf.mxu0 }
  0xe6   : > { %v2722_v49 = vpop.f32.mrf.mxu1 }
  0xe7   : > { %v2724_v9 = vpop.f32.mrf.mxu0 }
  0xe8   : > { %v2726_v29 = vpop.f32.mrf.mxu1 }
  0xe9   : > { %v2728_v17 = vpop.f32.mrf.mxu0 }
  0xea   : > { %v2730_v0 = vpop.f32.mrf.mxu1 }
  0xeb   : > { %v2732_v18 = vpop.f32.mrf.mxu0 }
  0xec   : > { %v2734_v10 = vpop.f32.mrf.mxu1 }
  0xed   : > { %v2736_v11 = vpop.f32.mrf.mxu0 }
  0xee   : > { %v2738_v23 = vpop.f32.mrf.mxu1 }
  0xef   : > { %v2740_v61 = vpop.f32.mrf.mxu0 }
  0xf0   : > { %v2742_v50 = vpop.f32.mrf.mxu1 }
  0xf1   : > { %v2744_v51 = vpop.f32.mrf.mxu0 }
  0xf2   : > { %v2746_v30 = vpop.f32.mrf.mxu1 }
  0xf3   : > { %v2748_v39 = vpop.f32.mrf.mxu0 }
  0xf4   : > { %v2750_v3 = vpop.f32.mrf.mxu1 }
  0xf5   : > { %v2752_v12 = vpop.f32.mrf.mxu0 }
  0xf6   : > { %v2754_v13 = vpop.f32.mrf.mxu1 }
  0xf7   : > { %v2756_v5 = vpop.f32.mrf.mxu0 }
  0xf8   : > { %v2758_v14 = vpop.f32.mrf.mxu1 }
  0xf9   : > { %v2760_v15 = vpop.f32.mrf.mxu0 }
  0xfa   : > { %v2762_v7 = vpop.f32.mrf.mxu1 }
  0xfb   : > { %3039 = vst [vmem:[#allocation3_spill] sm:$0xff] %v2762_v7  ;;  %v2764_v32 = vpop.f32.mrf.mxu0 }
  0xfc   : > { %3040 = vst [vmem:[#allocation6_spill] sm:$0xff] %v2764_v32  ;;  %v2766_v40 = vpop.f32.mrf.mxu1 }
  0xfd   : > { %3041 = vst [vmem:[#allocation7_spill] sm:$0xff] %v2766_v40  ;;  %v2768_v48 = vpop.f32.mrf.mxu0 }
  0xfe   : > { %3042 = vst [vmem:[#allocation8_spill] sm:$0xff] %v2768_v48  ;;  %v2044_v53 = vpop.f32.mrf.mxu1  ;;  %v627_v48 = vadd.f32 %v1983_v62, %v1951_v52 }
  0xff   : > { %v2012_v43 = vpop.f32.mrf.mxu0 }
 0x100   : > { %v960_v46 = vpop.f32.mrf.mxu1  ;;  %v786_v45 = vadd.f32 %v2012_v43, %v615_v16 }
 0x101   : > { %v778_v54 = vpop.f32.mrf.mxu0 }
 0x102   : > { %v2047_v56 = vpop.f32.mrf.mxu1  ;;  %v779_v7 = vadd.f32 %v778_v54, %v609_v35  ;;  %v633_v35 = vadd.f32 %v2726_v29, %v2728_v17  ;;  %v645_v29 = vadd.f32 %v2734_v10, %v2736_v11 }
 0x103   : > { %v2015_v34 = vpop.f32.mrf.mxu0 }
 0x104   : > { %v976_v44 = vpop.f32.mrf.mxu1  ;;  %v800_v41 = vadd.f32 %v2015_v34, %v627_v48  ;;  %v961_v31 = vadd.f32 %v960_v46, %v779_v7 }
 0x105   : > { %v792_v19 = vpop.f32.mrf.mxu0 }
 0x106   : > { %v2050_v57 = vpop.f32.mrf.mxu1  ;;  %v985_v54 = vadd.f32 %v2047_v56, %v800_v41 }
 0x107   : > { %v2018_v2 = vpop.f32.mrf.mxu0 }
 0x108   : > { %v2770_v20 = vpop.f32.mrf.mxu1 }
 0x109   : > { %v806_v21 = vpop.f32.mrf.mxu0 }
 0x10a   : > { %v2772_v58 = vpop.f32.mrf.mxu1 }
 0x10b   : > { %v2021_v6 = vpop.f32.mrf.mxu0 }
 0x10c   : > { %v2774_v26 = vpop.f32.mrf.mxu1 }
 0x10d   : > { %v820_v27 = vpop.f32.mrf.mxu0 }
 0x10e   : > { %v2776_v25 = vpop.f32.mrf.mxu1 }
 0x10f   : > { %v2778_v33 = vpop.f32.mrf.mxu0 }
 0x110   : > { %v2780_v28 = vpop.f32.mrf.mxu1 }
 0x111   : > { %v2782_v37 = vpop.f32.mrf.mxu0 }
 0x112   : > { %v2784_v42 = vpop.f32.mrf.mxu1 }
 0x113   : > { %v2786_v1 = vpop.f32.mrf.mxu0 }
 0x114   : > { %v2788_v38 = vpop.f32.mrf.mxu1 }
 0x115   : > { %3043 = vst [vmem:[#allocation9_spill] sm:$0xff] %v2788_v38  ;;  %v2790_v63 = vpop.f32.mrf.mxu0 }
 0x116   : > { %v2792_v59 = vpop.f32.mrf.mxu1 }
 0x117   : > { %3044 = vst [vmem:[#allocation10_spill] sm:$0xff] %v2792_v59  ;;  %v2794_v8 = vpop.f32.mrf.mxu0  ;;  %v621_v59 = vadd.f32 %v2720_v55, %v387_v60  ;;  %v807_v60 = vadd.f32 %v806_v21, %v633_v35  ;;  %v669_v35 = vadd.f32 %v2750_v3, %v2752_v12 }
 0x118   : > { %3045 = vst [vmem:[#allocation11_spill] sm:$0xff] %v2794_v8  ;;  %v2796_v24 = vpop.f32.mrf.mxu1  ;;  %v969_v8 = vadd.f32 %v2044_v53, %v786_v45  ;;  %v651_v45 = vadd.f32 %v2730_v0, %v2732_v18  ;;  %v663_v18 = vadd.f32 %v2738_v23, %v2740_v61 }
 0x119   : > { %3046 = vst [vmem:[#allocation12_spill] sm:$0xff] %v2796_v24  ;;  %v2798_v36 = vpop.f32.mrf.mxu0  ;;  %v639_v24 = vadd.f32 %v2722_v49, %v2724_v9  ;;  %v793_v43 = vadd.f32 %v792_v19, %v621_v59  ;;  %v849_v3 = vadd.f32 %v2790_v63, %v669_v35 }
 0x11a   : > { %v2800_v4 = vpop.f32.mrf.mxu1  ;;  %v828_v34 = vadd.f32 %v2021_v6, %v651_v45 }
 0x11b   : > { %3047 = vst [vmem:[#allocation13_spill] sm:$0xff] %v2800_v4  ;;  %v2802_v40 = vpop.f32.mrf.mxu0  ;;  %v814_v62 = vadd.f32 %v2018_v2, %v639_v24  ;;  %v977_v49 = vadd.f32 %v976_v44, %v793_v43  ;;  %v993_v44 = vadd.f32 %v2770_v20, %v807_v60  ;;  %v842_v24 = vadd.f32 %v2778_v33, %v663_v18 }
 0x11c   : > { %v2804_v38 = vpop.f32.mrf.mxu1  ;;  %v1017_v6 = vadd.f32 %v2772_v58, %v828_v34 }
 0x11d   : > { %3048 = vst [vmem:[#allocation14_spill] sm:$0xff] %v2804_v38  ;;  %v2806_v32 = vpop.f32.mrf.mxu0  ;;  %v1001_v17 = vadd.f32 %v2050_v57, %v814_v62  ;;  %v657_v57 = vadd.f32 %v2742_v50, %v2744_v51  ;;  %v1033_v62 = vadd.f32 %v2776_v25, %v842_v24 }
 0x11e   : > { %3049 = vst [vmem:[#allocation15_spill] sm:$0xff] %v2806_v32  ;;  %v2108_v22 = vpop.f32.mrf.mxu1 }
 0x11f   : > { %v2076_v47 = vpop.f32.mrf.mxu0  ;;  %v835_v43 = vadd.f32 %v2782_v37, %v657_v57 }
 0x120   : > { %v1170_v16 = vadd.f32 %v2076_v47, %v969_v8  ;;  %v1328_v4 = vpop.f32.mrf.mxu1 }
 0x121   : > { %v1163_v52 = vpop.f32.mrf.mxu0 }
 0x122   : > { %v1335_v38 = vadd.f32 %v2108_v22, %v1170_v16  ;;  %v1164_v32 = vadd.f32 %v1163_v52, %v961_v31  ;;  %v2111_v55 = vpop.f32.mrf.mxu1  ;;  %v675_v31 = vadd.f32 %v2746_v30, %v2748_v39 }
 0x123   : > { %v2079_v48 = vpop.f32.mrf.mxu0 }
 0x124   : > { %v1423_v9 = vmul.f32 %v1335_v38, %v1335_v38  ;;  %v1329_v7 = vadd.f32 %v1328_v4, %v1164_v32  ;;  %v1182_v53 = vadd.f32 %v2079_v48, %v985_v54  ;;  %v1340_v46 = vpop.f32.mrf.mxu1  ;;  %v821_v32 = vadd.f32 %v820_v27, %v645_v29 }
 0x125   : > { %v1175_v56 = vpop.f32.mrf.mxu0  ;;  %v856_v52 = vadd.f32 %v2786_v1, %v675_v31  ;;  %v1025_v48 = vadd.f32 %v2780_v28, %v835_v43  ;;  %v3058_v31 = vld [vmem:[#allocation15_spill] sm:$0xff] }
 0x126   : > { %v1422_v19 = vmul.f32 %v1329_v7, %v1329_v7  ;;  %v1347_v2 = vadd.f32 %v2111_v55, %v1182_v53  ;;  %v1176_v59 = vadd.f32 %v1175_v56, %v977_v49  ;;  %v1442_v8 = vsel %vm1438_vm1, %v1423_v9, 0.0  ;;  %v2114_v0 = vpop.f32.mrf.mxu1 }
 0x127   : > { %1443 = vadd.xlane.f32.xlu0 %v1442_v8  ;;  %v2082_v4 = vpop.f32.mrf.mxu0  ;;  %v1009_v51 = vadd.f32 %v2774_v26, %v821_v32  ;;  %v687_v26 = vadd.f32 %v2754_v13, %v2756_v5  ;;  %v681_v7 = vadd.f32 %v2758_v14, %v2760_v15  ;;  %v1049_v53 = vadd.f32 %v2784_v42, %v856_v52  ;;  %v3053_v14 = vld [vmem:[#allocation9_spill] sm:$0xff]  ;;  %v3054_v32 = vld [vmem:[#allocation8_spill] sm:$0xff] }
 0x128   : > { %v1425_v21 = vmul.f32 %v1347_v2, %v1347_v2  ;;  %v1341_v38 = vadd.f32 %v1340_v46, %v1176_v59  ;;  %v1194_v10 = vadd.f32 %v2082_v4, %v1001_v17  ;;  %v1352_v11 = vpop.f32.mrf.mxu1  ;;  %v1439_v22 = vsel %vm1438_vm1, %v1422_v19, 0.0  ;;  %v3050_v46 = vld [vmem:[#allocation11_spill] sm:$0xff]  ;;  %v3051_v19 = vld [vmem:[#allocation6_spill] sm:$0xff] }
 0x129   : > { %v1187_v41 = vpop.f32.mrf.mxu0  ;;  %v870_v29 = vadd.f32 %v3050_v46, %v687_v26  ;;  %v3052_v2 = vld [vmem:[#allocation3_spill] sm:$0xff]  ;;  %v863_v8 = vadd.f32 %v2798_v36, %v681_v7  ;;  %v1041_v15 = vadd.f32 %v3053_v14, %v849_v3  ;;  %v1594_v14 = vpop.xlane.xlu0 %1593 }
 0x12a   : > { %v1424_v23 = vmul.f32 %v1341_v38, %v1341_v38  ;;  %v1188_v61 = vadd.f32 %v1187_v41, %v993_v44  ;;  %v1359_v20 = vadd.f32 %v2114_v0, %v1194_v10  ;;  %v1448_v47 = vsel %vm1438_vm1, %v1425_v21, 0.0  ;;  %v2117_v27 = vpop.f32.mrf.mxu1  ;;  %v3055_v21 = vld [vmem:[#allocation7_spill] sm:$0xff]  ;;  %v3056_v10 = vld [vmem:[#allocation10_spill] sm:$0xff] }
 0x12b   : > { %1449 = vadd.xlane.f32.xlu1 %v1448_v47  ;;  %v2085_v50 = vpop.f32.mrf.mxu0  ;;  %1440 = vadd.xlane.f32.xlu0 %v1439_v22  ;;  %v699_v59 = vadd.f32 %v3052_v2, %v3051_v19  ;;  %v693_v38 = vadd.f32 %v3055_v21, %v3054_v32  ;;  %v3063_v19 = vld [vmem:[#allocation5_spill] sm:$0xff] }
 0x12c   : > { %v1353_v58 = vadd.f32 %v1352_v11, %v1188_v61  ;;  %v1206_v33 = vadd.f32 %v2085_v50, %v1017_v6  ;;  %v1364_v16 = vpop.f32.mrf.mxu1  ;;  %v1427_v54 = vmul.f32 %v1359_v20, %v1359_v20  ;;  %v1445_v45 = vsel %vm1438_vm1, %v1424_v23, 0.0  ;;  %v3057_v20 = vld [vmem:[#allocation12_spill] sm:$0xff] }
 0x12d   : > { %v1199_v55 = vpop.f32.mrf.mxu0  ;;  %v1065_v11 = vadd.f32 %v3056_v10, %v870_v29  ;;  %v884_v57 = vadd.f32 %v2802_v40, %v699_v59  ;;  %v1057_v47 = vadd.f32 %v3057_v20, %v863_v8  ;;  %v877_v43 = vadd.f32 %v3058_v31, %v693_v38 }
 0x12e   : > { %v1426_v30 = vmul.f32 %v1353_v58, %v1353_v58  ;;  %v1200_v39 = vadd.f32 %v1199_v55, %v1009_v51  ;;  %v1371_v37 = vadd.f32 %v2117_v27, %v1206_v33  ;;  %v2120_v60 = vpop.f32.mrf.mxu1  ;;  %v1454_v63 = vsel %vm1438_vm1, %v1427_v54, 0.0  ;;  %v3059_v33 = vld [vmem:[#allocation13_spill] sm:$0xff] }
 0x12f   : > { %v2088_v49 = vpop.f32.mrf.mxu0  ;;  %1446 = vadd.xlane.f32.xlu1 %v1445_v45  ;;  %v3060_v45 = vld [vmem:[#allocation14_spill] sm:$0xff] }
 0x130   : > { %v1218_v12 = vadd.f32 %v2088_v49, %v1033_v62  ;;  %v1365_v25 = vadd.f32 %v1364_v16, %v1200_v39  ;;  %v1451_v1 = vsel %vm1438_vm1, %v1426_v30, 0.0  ;;  %v1376_v9 = vpop.f32.mrf.mxu1  ;;  %v1429_v17 = vmul.f32 %v1371_v37, %v1371_v37 }
 0x131   : > { %v1211_v13 = vpop.f32.mrf.mxu0  ;;  %1452 = vadd.xlane.f32.xlu0 %v1451_v1  ;;  %v1081_v16 = vadd.f32 %v3059_v33, %v884_v57 }
 0x132   : > { %v1428_v5 = vmul.f32 %v1365_v25, %v1365_v25  ;;  %v1212_v28 = vadd.f32 %v1211_v13, %v1025_v48  ;;  %v1383_v34 = vadd.f32 %v2120_v60, %v1218_v12  ;;  %v2123_v56 = vpop.f32.mrf.mxu1  ;;  %v1460_v36 = vsel %vm1438_vm1, %v1429_v17, 0.0 }
 0x133   : > { %v2091_v0 = vpop.f32.mrf.mxu0  ;;  %1455 = vadd.xlane.f32.xlu1 %v1454_v63  ;;  %v1073_v60 = vadd.f32 %v3060_v45, %v877_v43 }
 0x134   : > { %v1230_v42 = vadd.f32 %v2091_v0, %v1049_v53  ;;  %v1377_v18 = vadd.f32 %v1376_v9, %v1212_v28  ;;  %v1457_v44 = vsel %vm1438_vm1, %v1428_v5, 0.0  ;;  %v1388_v4 = vpop.f32.mrf.mxu1  ;;  %v1431_v24 = vmul.f32 %v1383_v34, %v1383_v34  ;;  %v3061_v28 = vld [vmem:[#allocation4_spill] sm:$0xff]  ;;  %v3062_v34 = vld [vmem:[#allocation2_spill] sm:$0xff] }
 0x135   : > { %v1223_v6 = vpop.f32.mrf.mxu0  ;;  %1458 = vadd.xlane.f32.xlu0 %v1457_v44  ;;  %v1506_v63 = vmul.f32 %v3062_v34, %v3061_v28  ;;  %v1507_v2 = vmul.f32 %v3062_v34, %v3063_v19 }
 0x136   : > { %v1430_v41 = vmul.f32 %v1377_v18, %v1377_v18  ;;  %v1224_v22 = vadd.f32 %v1223_v6, %v1041_v15  ;;  %v1395_v23 = vadd.f32 %v2123_v56, %v1230_v42  ;;  %v2126_v61 = vpop.f32.mrf.mxu1  ;;  %v1466_v30 = vsel %vm1438_vm1, %v1431_v24, 0.0  ;;  %v1597_v15 = vpop.xlane.xlu1 %1596 }
 0x137   : > { %v2094_v27 = vpop.f32.mrf.mxu0  ;;  %1461 = vadd.xlane.f32.xlu1 %v1460_v36  ;;  %v1550_v8 = vsel %vm243_vm0, %v1506_v63, 0.0  ;;  %v1553_v0 = vsel %vm243_vm0, %v1507_v2, 0.0  ;;  %v1600_v42 = vpop.xlane.xlu0 %1599 }
 0x138   : > { %v1242_v50 = vadd.f32 %v2094_v27, %v1065_v11  ;;  %v1389_v51 = vadd.f32 %v1388_v4, %v1224_v22  ;;  %v1463_v58 = vsel %vm1438_vm1, %v1430_v41, 0.0  ;;  %v1400_v40 = vpop.f32.mrf.mxu1  ;;  %v1433_v35 = vmul.f32 %v1395_v23, %v1395_v23 }
 0x139   : > { %v1235_v62 = vpop.f32.mrf.mxu0  ;;  %1464 = vadd.xlane.f32.xlu0 %v1463_v58 }
 0x13a   : > { %v1432_v52 = vmul.f32 %v1389_v51, %v1389_v51  ;;  %v1236_v54 = vadd.f32 %v1235_v62, %v1057_v47  ;;  %v1407_v55 = vadd.f32 %v2126_v61, %v1242_v50  ;;  %v2129_v39 = vpop.f32.mrf.mxu1  ;;  %v1472_v25 = vsel %vm1438_vm1, %v1433_v35, 0.0  ;;  %v1603_v18 = vpop.xlane.xlu1 %1602 }
 0x13b   : > { %v2097_v37 = vpop.f32.mrf.mxu0  ;;  %1467 = vadd.xlane.f32.xlu1 %v1466_v30  ;;  %v1606_v44 = vpop.xlane.xlu0 %1605 }
 0x13c   : > { %v1254_v26 = vadd.f32 %v2097_v37, %v1081_v16  ;;  %v1401_v48 = vadd.f32 %v1400_v40, %v1236_v54  ;;  %v1469_v49 = vsel %vm1438_vm1, %v1432_v52, 0.0  ;;  %v1412_v12 = vpop.f32.mrf.mxu1  ;;  %v1435_v1 = vmul.f32 %v1407_v55, %v1407_v55  ;;  %v1689_v54 = vld [vmem:[%s2914_s8 + $0x8] sm:$0xff] }
 0x13d   : > { %v1247_v3 = vpop.f32.mrf.mxu0  ;;  %1470 = vadd.xlane.f32.xlu0 %v1469_v49  ;;  %v1691_v49 = vld [vmem:[%s2914_s8 + $0x18] sm:$0xff] }
 0x13e   : > { %v1434_v9 = vmul.f32 %v1401_v48, %v1401_v48  ;;  %v1248_v7 = vadd.f32 %v1247_v3, %v1073_v60  ;;  %v1419_v53 = vadd.f32 %v2129_v39, %v1254_v26  ;;  %v1478_v5 = vsel %vm1438_vm1, %v1435_v1, 0.0  ;;  %v2874_v4 = vpop.xlane.xlu1 %1608  ;;  %v1688_v3 = vld [vmem:[%s2914_s8] sm:$0xff] }
 0x13f   : > { %1473 = vadd.xlane.f32.xlu1 %v1472_v25  ;;  %v2876_v32 = vpop.xlane.xlu0 %1611 }
 0x140   : > { %v1413_v46 = vadd.f32 %v1412_v12, %v1248_v7  ;;  %v1475_v29 = vsel %vm1438_vm1, %v1434_v9, 0.0  ;;  %v1437_v17 = vmul.f32 %v1419_v53, %v1419_v53 }
 0x141   : > { %1476 = vadd.xlane.f32.xlu0 %v1475_v29 }
 0x142   : > { %v1436_v13 = vmul.f32 %v1413_v46, %v1413_v46  ;;  %v1484_v59 = vsel %vm1438_vm1, %v1437_v17, 0.0  ;;  %v2878_v21 = vpop.xlane.xlu1 %1614 }
 0x143   : > { %1479 = vadd.xlane.f32.xlu1 %v1478_v5  ;;  %v2880_v38 = vpop.xlane.xlu0 %1617 }
 0x144   : > { %v1481_v56 = vsel %vm1438_vm1, %v1436_v13, 0.0  ;;  %v1690_v13 = vld [vmem:[%s2914_s8 + $0x10] sm:$0xff] }
 0x145   : > { %1482 = vadd.xlane.f32.xlu0 %v1481_v56  ;;  %v1692_v56 = vld [vmem:[%s2914_s8 + $0x20] sm:$0xff] }
 0x146   : > { %v2882_v10 = vpop.xlane.xlu1 %1620 }
 0x147   : > { %1485 = vadd.xlane.f32.xlu1 %v1484_v59  ;;  %v2884_v11 = vpop.xlane.xlu0 %1623 }
 0x149   : > { %1551 = vadd.xlane.f32.xlu0 %v1550_v8 }
 0x14a   : > { %v2886_v57 = vpop.xlane.xlu1 %1626 }
 0x14b   : > { %1554 = vadd.xlane.f32.xlu1 %v1553_v0  ;;  %v2888_v6 = vpop.xlane.xlu0 %1629 }
 0x14e   : > { %v2890_v36 = vpop.xlane.xlu1 %1632 }
 0x14f   : > { %v2892_v24 = vpop.xlane.xlu0 %1635 }
 0x152   : > { %v2894_v41 = vpop.xlane.xlu1 %1638 }
 0x153   : > { %v1510_v22 = vpop.xlane.xlu0 %1509 }
 0x156   : > { %v1513_v23 = vpop.xlane.xlu1 %1512 }
 0x157   : > { %v1516_v61 = vpop.xlane.xlu0 %1515 }
 0x15a   : > { %v1519_v20 = vpop.xlane.xlu1 %1518 }
 0x15b   : > { %v1522_v47 = vpop.xlane.xlu0 %1521 }
 0x15e   : > { %v1525_v27 = vpop.xlane.xlu1 %1524 }
 0x15f   : > { %v1528_v31 = vpop.xlane.xlu0 %1527 }
 0x162   : > { %v2896_v43 = vpop.xlane.xlu1 %1530 }
 0x163   : > { %v2898_v50 = vpop.xlane.xlu0 %1533 }
 0x166   : > { %v2900_v51 = vpop.xlane.xlu1 %1536 }
 0x167   : > { %v2902_v58 = vpop.xlane.xlu0 %1539 }
 0x16a   : > { %v2904_v40 = vpop.xlane.xlu1 %1542 }
 0x16b   : > { %v2906_v33 = vpop.xlane.xlu0 %1545 }
 0x16e   : > { %v2908_v16 = vpop.xlane.xlu1 %1548 }
 0x1b0   : > { %v1444_v35 = vpop.xlane.xlu0 %1443 }
 0x1b1   : > { %v1641_v62 = vsub.f32 %v1444_v35, %v1597_v15  ;;  %v1695_v35 = vld [vmem:[%s2914_s8 + $0x38] sm:$0xff] }
 0x1b3   : > { %v1657_v52 = vmul.f32 0.5, %v1641_v62 }
 0x1b4   : > { %v1450_v55 = vpop.xlane.xlu1 %1449  ;;  %v1441_v30 = vpop.xlane.xlu0 %1440 }
 0x1b5   : > { %v1673_v39 = vadd.f32 %v1657_v52, %v1513_v23  ;;  %v1643_v37 = vsub.f32 %v1450_v55, %v1603_v18  ;;  %v1640_v45 = vsub.f32 %v1441_v30, %v1594_v14  ;;  %v1693_v14 = vld [vmem:[%s2914_s8 + $0x28] sm:$0xff]  ;;  %v1696_v55 = vld [vmem:[%s2914_s8 + $0x40] sm:$0xff] }
 0x1b7   : > { %v1705_v60 = vadd.f32 %v1689_v54, %v1673_v39  ;;  %v1659_v26 = vmul.f32 0.5, %v1643_v37  ;;  %v1656_v48 = vmul.f32 0.5, %v1640_v45  ;;  %v1697_v45 = vld [vmem:[%s2914_s8 + $0x48] sm:$0xff] }
 0x1b8   : > { %v1447_v12 = vpop.xlane.xlu1 %1446 }
 0x1b9   : > { %1722 = vst.msk [vmem:[%s2921_s11 + $0x8] sm:$0xff] %vm1720_vm2, %v1705_v60  ;;  %v1675_v25 = vadd.f32 %v1659_v26, %v1519_v20  ;;  %v1672_v1 = vadd.f32 %v1656_v48, %v1510_v22  ;;  %v1642_v9 = vsub.f32 %v1447_v12, %v1600_v42  ;;  %v1694_v22 = vld [vmem:[%s2914_s8 + $0x30] sm:$0xff] }
 0x1ba   : > { %v1453_v7 = vpop.xlane.xlu0 %1452 }
 0x1bb   : > { %v1707_v53 = vadd.f32 %v1691_v49, %v1675_v25  ;;  %v1704_v46 = vadd.f32 %v1688_v3, %v1672_v1  ;;  %v1658_v29 = vmul.f32 0.5, %v1642_v9  ;;  %v1644_v17 = vsub.f32 %v1453_v7, %v1606_v44  ;;  %v1698_v49 = vld [vmem:[%s2914_s8 + $0x50] sm:$0xff]  ;;  %v1699_v1 = vld [vmem:[%s2914_s8 + $0x58] sm:$0xff] }
 0x1bc   : > { %v1456_v5 = vpop.xlane.xlu1 %1455 }
 0x1bd   : > { %1724 = vst.msk [vmem:[%s2921_s11 + $0x18] sm:$0xff] %vm1720_vm2, %v1707_v53  ;;  %1721 = vst.msk [vmem:[%s2921_s11] sm:$0xff] %vm1720_vm2, %v1704_v46  ;;  %v1674_v28 = vadd.f32 %v1658_v29, %v1516_v61  ;;  %v1660_v34 = vmul.f32 0.5, %v1644_v17  ;;  %v1645_v63 = vsub.f32 %v1456_v5, %v2874_v4  ;;  %v1700_v46 = vld [vmem:[%s2914_s8 + $0x60] sm:$0xff]  ;;  %v1701_v5 = vld [vmem:[%s2914_s8 + $0x68] sm:$0xff] }
 0x1be   : > { %v1459_v19 = vpop.xlane.xlu0 %1458 }
 0x1bf   : > { %v1706_v2 = vadd.f32 %v1690_v13, %v1674_v28  ;;  %v1676_v59 = vadd.f32 %v1660_v34, %v1522_v47  ;;  %v1661_v8 = vmul.f32 0.5, %v1645_v63  ;;  %v1646_v0 = vsub.f32 %v1459_v19, %v2876_v32 }
 0x1c0   : > { %v1462_v15 = vpop.xlane.xlu1 %1461 }
 0x1c1   : > { %1723 = vst.msk [vmem:[%s2921_s11 + $0x10] sm:$0xff] %vm1720_vm2, %v1706_v2  ;;  %v1708_v42 = vadd.f32 %v1692_v56, %v1676_v59  ;;  %v1677_v18 = vadd.f32 %v1661_v8, %v1525_v27  ;;  %v1662_v44 = vmul.f32 0.5, %v1646_v0  ;;  %v1647_v4 = vsub.f32 %v1462_v15, %v2878_v21  ;;  %v1702_v56 = vld [vmem:[%s2914_s8 + $0x70] sm:$0xff]  ;;  %v1703_v59 = vld [vmem:[%s2914_s8 + $0x78] sm:$0xff] }
 0x1c2   : > { %v1465_v23 = vpop.xlane.xlu0 %1464 }
 0x1c3   : > { %1725 = vst.msk [vmem:[%s2921_s11 + $0x20] sm:$0xff] %vm1720_vm2, %v1708_v42  ;;  %v1709_v61 = vadd.f32 %v1693_v14, %v1677_v18  ;;  %v1678_v20 = vadd.f32 %v1662_v44, %v1528_v31  ;;  %v1663_v47 = vmul.f32 0.5, %v1647_v4  ;;  %v1648_v32 = vsub.f32 %v1465_v23, %v2880_v38 }
 0x1c4   : > { %v1468_v62 = vpop.xlane.xlu1 %1467 }
 0x1c5   : > { %1726 = vst.msk [vmem:[%s2921_s11 + $0x28] sm:$0xff] %vm1720_vm2, %v1709_v61  ;;  %v1710_v27 = vadd.f32 %v1694_v22, %v1678_v20  ;;  %v1679_v52 = vadd.f32 %v1663_v47, %v2896_v43  ;;  %v1664_v21 = vmul.f32 0.5, %v1648_v32  ;;  %v1649_v54 = vsub.f32 %v1468_v62, %v2882_v10 }
 0x1c6   : > { %v1471_v30 = vpop.xlane.xlu0 %1470 }
 0x1c7   : > { %1727 = vst.msk [vmem:[%s2921_s11 + $0x30] sm:$0xff] %vm1720_vm2, %v1710_v27  ;;  %v1711_v31 = vadd.f32 %v1695_v35, %v1679_v52  ;;  %v1680_v38 = vadd.f32 %v1664_v21, %v2898_v50  ;;  %v1665_v39 = vmul.f32 0.5, %v1649_v54  ;;  %v1650_v37 = vsub.f32 %v1471_v30, %v2884_v11 }
 0x1c8   : > { %v1474_v60 = vpop.xlane.xlu1 %1473 }
 0x1c9   : > { %1728 = vst.msk [vmem:[%s2921_s11 + $0x38] sm:$0xff] %vm1720_vm2, %v1711_v31  ;;  %v1712_v43 = vadd.f32 %v1696_v55, %v1680_v38  ;;  %v1681_v10 = vadd.f32 %v1665_v39, %v2900_v51  ;;  %v1666_v26 = vmul.f32 0.5, %v1650_v37  ;;  %v1651_v48 = vsub.f32 %v1474_v60, %v2886_v57 }
 0x1ca   : > { %v1477_v3 = vpop.xlane.xlu0 %1476 }
 0x1cb   : > { %1729 = vst.msk [vmem:[%s2921_s11 + $0x40] sm:$0xff] %vm1720_vm2, %v1712_v43  ;;  %v1713_v50 = vadd.f32 %v1697_v45, %v1681_v10  ;;  %v1682_v11 = vadd.f32 %v1666_v26, %v2902_v58  ;;  %v1667_v12 = vmul.f32 0.5, %v1651_v48  ;;  %v1652_v25 = vsub.f32 %v1477_v3, %v2888_v6 }
 0x1cc   : > { %v1480_v9 = vpop.xlane.xlu1 %1479 }
 0x1cd   : > { %1730 = vst.msk [vmem:[%s2921_s11 + $0x48] sm:$0xff] %vm1720_vm2, %v1713_v50  ;;  %v1714_v51 = vadd.f32 %v1698_v49, %v1682_v11  ;;  %v1683_v57 = vadd.f32 %v1667_v12, %v2904_v40  ;;  %v1668_v7 = vmul.f32 0.5, %v1652_v25  ;;  %v1653_v53 = vsub.f32 %v1480_v9, %v2890_v36 }
 0x1ce   : > { %v1483_v29 = vpop.xlane.xlu0 %1482 }
 0x1cf   : > { %1731 = vst.msk [vmem:[%s2921_s11 + $0x50] sm:$0xff] %vm1720_vm2, %v1714_v51  ;;  %v1715_v58 = vadd.f32 %v1699_v1, %v1683_v57  ;;  %v1684_v6 = vadd.f32 %v1668_v7, %v2906_v33  ;;  %v1669_v17 = vmul.f32 0.5, %v1653_v53  ;;  %v1654_v13 = vsub.f32 %v1483_v29, %v2892_v24 }
 0x1d0   : > { %v1486_v28 = vpop.xlane.xlu1 %1485 }
 0x1d1   : > { %1732 = vst.msk [vmem:[%s2921_s11 + $0x58] sm:$0xff] %vm1720_vm2, %v1715_v58  ;;  %v1716_v40 = vadd.f32 %v1700_v46, %v1684_v6  ;;  %v1685_v36 = vadd.f32 %v1669_v17, %v2908_v16  ;;  %v1670_v34 = vmul.f32 0.5, %v1654_v13  ;;  %v1655_v63 = vsub.f32 %v1486_v28, %v2894_v41 }
 0x1d2   : > { %v1552_v19 = vpop.xlane.xlu0 %1551 }
 0x1d3   : > { %1733 = vst.msk [vmem:[%s2921_s11 + $0x60] sm:$0xff] %vm1720_vm2, %v1716_v40  ;;  %v1717_v33 = vadd.f32 %v1701_v5, %v1685_v36  ;;  %v1671_v2 = vmul.f32 0.5, %v1655_v63  ;;  %v1686_v24 = vadd.f32 %v1670_v34, %v1552_v19 }
 0x1d4   : > { %v1555_v8 = vpop.xlane.xlu1 %1554 }
 0x1d5   : > { %1734 = vst.msk [vmem:[%s2921_s11 + $0x68] sm:$0xff] %vm1720_vm2, %v1717_v33  ;;  %v1718_v0 = vadd.f32 %v1702_v56, %v1686_v24  ;;  %v1687_v14 = vadd.f32 %v1671_v2, %v1555_v8 }
 0x1d7   : > { %1735 = vst.msk [vmem:[%s2921_s11 + $0x70] sm:$0xff] %vm1720_vm2, %v1718_v0  ;;  %v1719_v16 = vadd.f32 %v1703_v59, %v1687_v14 }
 0x1d9   : > { %1736 = vst.msk [vmem:[%s2921_s11 + $0x78] sm:$0xff] %vm1720_vm2, %v1719_v16 }
 0x1da PF: > { %s14_s15 = sadd.s32 1, %s2144_s15  }
 0x1db   : > { %p11_p4 = scmp.ge.s32.totalorder %s14_s15, 4  }
 0x1dd   :  { %13 = sbr.rel (!%p11_p4) target bundleno = 1 (0x1), region = 69 }

</bundles_post_ra>
